<compile_context>
chip_gen: v7x
topology: tpu7x:2x2x1
jax: 0.10.0
libtpu: 0.0.40
codegen_flags: <defaults>
</compile_context>

<pallas_src>
import functools

import jax
import jax.numpy as jnp
from jax.experimental import pallas as pl
from jax.experimental.pallas import tpu as pltpu

LANE = 128
SUBLANE = 8
NC = 2          # row-sweep splits (maps to the 2 TensorCores on v7x)
TR_MAX = 2048   # max tile rows: 6 MiB of double-buffered inputs, safe on all gens


# ---------------------------------------------------------------------------
# Fused kernel: tiled EWC penalty + cross-entropy epilogue
# ---------------------------------------------------------------------------
def _ewc_fused_kernel(logits_ref, tgt_ref, fisher_ref, param_ref, mean_ref,
                      out_ref, acc_ref, *, weight):
    c = pl.program_id(0)          # "parallel" row-sweep split
    t = pl.program_id(1)          # "arbitrary" reduction axis over row tiles

    @pl.when(t == 0)
    def _init():
        acc_ref[...] = jnp.zeros_like(acc_ref)

    # Hot loop: elementwise, loads binding; keep cross-lane reduce out of it.
    d = param_ref[...] - mean_ref[...]
    acc_ref[...] += fisher_ref[...] * d * d

    @pl.when(t == pl.num_programs(1) - 1)
    def _finalize():
        pen = jnp.sum(acc_ref[...])                       # single XLU collapse

        # Cross-entropy (mean NLL) on the resident small logits block.
        logits = logits_ref[...].astype(jnp.float32)      # (B, C)
        tgt = tgt_ref[...]                                # (B, 1) int32
        m = jnp.max(logits, axis=1, keepdims=True)
        shifted = logits - m
        lse = jnp.log(jnp.sum(jnp.exp(shifted), axis=1, keepdims=True))
        col = jax.lax.broadcasted_iota(jnp.int32, logits.shape, 1)
        picked = jnp.sum(jnp.where(col == tgt, shifted, 0.0),
                         axis=1, keepdims=True)           # logit[target] - m
        ce = jnp.mean(lse - picked)
        ce = jnp.where(c == 0, ce, jnp.float32(0.0))      # CE counted once

        out_ref[...] = jnp.full((1, LANE), weight * pen + ce, dtype=jnp.float32)


# ---------------------------------------------------------------------------
# Packing: flatten / pad parameter pytrees into lane-dense (rows, 128) slabs
# ---------------------------------------------------------------------------
def _plan_layout(n_elems, nc=NC, tr_max=TR_MAX):
    rows = -(-n_elems // LANE)
    rows_per_core = -(-rows // nc)
    tr = min(tr_max, -(-rows_per_core // SUBLANE) * SUBLANE)
    tiles = -(-rows_per_core // tr)
    rows_padded = nc * tiles * tr
    return tr, tiles, rows_padded


def _pack_flat(tree_list, rows_padded):
    flat = jnp.concatenate([jnp.ravel(a).astype(jnp.float32) for a in tree_list])
    flat = jnp.pad(flat, (0, rows_padded * LANE - flat.shape[0]))
    return flat.reshape(rows_padded, LANE)


def make_ewc_state(means, fishers, nc=NC, tr_max=TR_MAX):
    """Done once at EWC.__init__ time: pack the frozen fisher / mean tensors."""
    n = sum(int(m.size) for m in means)
    tr, tiles, rows_padded = _plan_layout(n, nc, tr_max)
    return {
        "f2d": _pack_flat(fishers, rows_padded),   # zero pad -> 0 contribution
        "m2d": _pack_flat(means, rows_padded),
        "tr": tr, "tiles": tiles, "rows_padded": rows_padded, "nc": nc,
    }


def pack_current_params(model_params, state):
    """Pack the live model parameters into the same slab layout.

    A training loop should keep params pre-packed (or gather them in-kernel).
    """
    # TODO(synk): avoid this per-call concat/pad copy by DMA-ing each parameter
    # tensor from its original HBM location (memory_space=pl.ANY + scalar-
    # prefetched offsets) inside the kernel.
    return _pack_flat(model_params, state["rows_padded"])


# ---------------------------------------------------------------------------
# Forward
# ---------------------------------------------------------------------------
def ewc_loss_forward(current_prediction, target, packed_params, state,
                     weight=100.0):
    """CrossEntropy(logits, target) + weight * sum(fisher * (p - mean)^2)."""
    B, C = current_prediction.shape
    tgt2d = target.astype(jnp.int32).reshape(B, 1)
    nc, tiles, tr = state["nc"], state["tiles"], state["tr"]

    def slab_map(c, t):
        return (c * tiles + t, 0)

    kernel = functools.partial(_ewc_fused_kernel, weight=float(weight))

    out = pl.pallas_call(
        kernel,
        out_shape=jax.ShapeDtypeStruct((1, nc * LANE), jnp.float32),
        grid_spec=pltpu.PrefetchScalarGridSpec(
            num_scalar_prefetch=0,
            grid=(nc, tiles),
            in_specs=[
                pl.BlockSpec((B, C), lambda c, t: (0, 0)),     # logits (resident)
                pl.BlockSpec((B, 1), lambda c, t: (0, 0)),     # targets (resident)
                pl.BlockSpec((tr, LANE), slab_map),            # fisher
                pl.BlockSpec((tr, LANE), slab_map),            # params
                pl.BlockSpec((tr, LANE), slab_map),            # means
            ],
            out_specs=pl.BlockSpec((1, LANE), lambda c, t: (0, c)),
            scratch_shapes=[pltpu.VMEM((tr, LANE), jnp.float32)],
        ),
        compiler_params=pltpu.CompilerParams(
            dimension_semantics=("parallel", "arbitrary")),
    )(current_prediction, tgt2d, state["f2d"], packed_params, state["m2d"])

    # Each row-sweep split wrote its partial at lane 0 of its block; sum them.
    return jnp.sum(out.reshape(nc, LANE)[:, 0])


# ---------------------------------------------------------------------------
if __name__ == "__main__":
    key = jax.random.PRNGKey(0)
    k = jax.random.split(key, 10)

    B, C = 8, 10          # batch, num classes
    H_IN, H_MID = 64, 32  # small MLP "model": fc1 (32,64)+(32,), fc2 (10,32)+(10,)

    # Original (mean) parameters captured by EWC at init time.
    means = [
        jax.random.normal(k[0], (H_MID, H_IN), jnp.float32) * 0.1,
        jax.random.normal(k[1], (H_MID,), jnp.float32) * 0.1,
        jax.random.normal(k[2], (C, H_MID), jnp.float32) * 0.1,
        jax.random.normal(k[3], (C,), jnp.float32) * 0.1,
    ]
    # Current model parameters = means + drift.
    model_params = [m + 0.05 * jax.random.normal(k[4 + i], m.shape, jnp.float32)
                    for i, m in enumerate(means)]
    # Synthetic Fisher diagonal (non-negative, like squared gradients).
    # TODO(synk): the true Fisher estimation requires backward passes over a
    # dataset (done in EWC.__init__, not in forward); synthesized here.
    fishers = [jnp.square(jax.random.normal(k[8], m.shape, jnp.float32)) * 0.1
               for m in means]

    current_prediction = jax.random.normal(k[9], (B, C), jnp.float32)
    target = jnp.arange(B, dtype=jnp.int32) % C

    # "init": pack the frozen statistics once.
    state = make_ewc_state(means, fishers)
    # Live params packed into the same layout (would live in training state).
    p2d = pack_current_params(model_params, state)

    loss = ewc_loss_forward(current_prediction, target, p2d, state, weight=100.0)
    jax.block_until_ready(loss)

    # Pure-JAX reference check.
    logp = jax.nn.log_softmax(current_prediction, axis=1)
    ref_ce = -jnp.mean(logp[jnp.arange(B), target])
    ref_pen = sum(jnp.sum(f * (p - m) ** 2)
                  for f, p, m in zip(fishers, model_params, means))
    ref = ref_ce + 100.0 * ref_pen
    assert jnp.allclose(loss, ref, rtol=1e-5, atol=1e-5), (loss, ref)

    print("KERNEL_OK")
</pallas_src>

<mosaic_0001>
module attributes {stable_mosaic.version = 11 : i64} {
  func.func @_ewc_fused_kernel(%arg0: i32, %arg1: i32, %arg2: memref<8x10xf32, #tpu.memory_space<vmem>>, %arg3: memref<8x1xi32, #tpu.memory_space<vmem>>, %arg4: memref<16x128xf32, #tpu.memory_space<vmem>>, %arg5: memref<16x128xf32, #tpu.memory_space<vmem>>, %arg6: memref<16x128xf32, #tpu.memory_space<vmem>>, %arg7: memref<1x128xf32, #tpu.memory_space<vmem>>, %arg8: memref<16x128xf32, #tpu.memory_space<vmem>>) attributes {dimension_semantics = [#tpu.dimension_semantics<parallel>, #tpu.dimension_semantics<arbitrary>], iteration_bounds = array<i64: 2, 1>, scalar_prefetch = 0 : i64, scratch_operands = 1 : i64, tpu.core_type = #tpu.core_type<tc>, window_params = [{pipeline_mode = #tpu.pipeline_mode<synchronous>, transform_indices = @transform_0, window_bounds = array<i64: 8, 10>}, {pipeline_mode = #tpu.pipeline_mode<synchronous>, transform_indices = @transform_1, window_bounds = array<i64: 8, 1>}, {transform_indices = @transform_2, window_bounds = array<i64: 16, 128>}, {transform_indices = @transform_3, window_bounds = array<i64: 16, 128>}, {transform_indices = @transform_4, window_bounds = array<i64: 16, 128>}, {transform_indices = @transform_5, window_bounds = array<i64: 1, 128>}]} {
    %c0_i32 = arith.constant 0 : i32
    %0 = arith.cmpi eq, %arg1, %c0_i32 : i32
    %1 = arith.extui %0 : i1 to i32
    %c0_i32_0 = arith.constant 0 : i32
    %2 = arith.cmpi ne, %1, %c0_i32_0 : i32
    scf.if %2 {
      %cst = arith.constant 0.000000e+00 : f32
      %15 = vector.broadcast %cst : f32 to vector<16x128xf32>
      %c0_12 = arith.constant 0 : index
      %c0_13 = arith.constant 0 : index
      %16 = vector.load %arg8[%c0_12, %c0_13] : memref<16x128xf32, #tpu.memory_space<vmem>>, vector<16x128xf32>
      tpu.vector_store %arg8[%c0_12, %c0_13], %15 {strides = array<i32>} : memref<16x128xf32, #tpu.memory_space<vmem>>, vector<16x128xf32>,
    } else {
    }
    %c0 = arith.constant 0 : index
    %c0_1 = arith.constant 0 : index
    %3 = vector.load %arg5[%c0, %c0_1] : memref<16x128xf32, #tpu.memory_space<vmem>>, vector<16x128xf32>
    %c0_2 = arith.constant 0 : index
    %c0_3 = arith.constant 0 : index
    %4 = vector.load %arg6[%c0_2, %c0_3] : memref<16x128xf32, #tpu.memory_space<vmem>>, vector<16x128xf32>
    %5 = arith.subf %3, %4 : vector<16x128xf32>
    %c0_4 = arith.constant 0 : index
    %c0_5 = arith.constant 0 : index
    %6 = vector.load %arg8[%c0_4, %c0_5] : memref<16x128xf32, #tpu.memory_space<vmem>>, vector<16x128xf32>
    %c0_6 = arith.constant 0 : index
    %c0_7 = arith.constant 0 : index
    %7 = vector.load %arg4[%c0_6, %c0_7] : memref<16x128xf32, #tpu.memory_space<vmem>>, vector<16x128xf32>
    %8 = arith.mulf %7, %5 : vector<16x128xf32>
    %9 = arith.mulf %8, %5 : vector<16x128xf32>
    %10 = arith.addf %6, %9 : vector<16x128xf32>
    %c0_8 = arith.constant 0 : index
    %c0_9 = arith.constant 0 : index
    %11 = vector.load %arg8[%c0_8, %c0_9] : memref<16x128xf32, #tpu.memory_space<vmem>>, vector<16x128xf32>
    tpu.vector_store %arg8[%c0_8, %c0_9], %10 {strides = array<i32>} : memref<16x128xf32, #tpu.memory_space<vmem>>, vector<16x128xf32>,
    %c0_i32_10 = arith.constant 0 : i32
    %12 = arith.cmpi eq, %arg1, %c0_i32_10 : i32
    %13 = arith.extui %12 : i1 to i32
    %c0_i32_11 = arith.constant 0 : i32
    %14 = arith.cmpi ne, %13, %c0_i32_11 : i32
    scf.if %14 {
      %c0_12 = arith.constant 0 : index
      %c0_13 = arith.constant 0 : index
      %15 = vector.load %arg8[%c0_12, %c0_13] : memref<16x128xf32, #tpu.memory_space<vmem>>, vector<16x128xf32>
      %16 = vector.shape_cast %15 : vector<16x128xf32> to vector<1x16x128xf32>
      %cst = arith.constant dense<0.000000e+00> : vector<1xf32>
      %17 = vector.multi_reduction <add>, %16, %cst [1, 2] : vector<1x16x128xf32> to vector<1xf32>
      %18 = vector.shape_cast %17 : vector<1xf32> to vector<1x1x1xf32>
      %19 = vector.extract %18[0, 0, 0] : f32 from vector<1x1x1xf32>
      %c0_14 = arith.constant 0 : index
      %c0_15 = arith.constant 0 : index
      %20 = vector.load %arg2[%c0_14, %c0_15] : memref<8x10xf32, #tpu.memory_space<vmem>>, vector<8x10xf32>
      %c0_16 = arith.constant 0 : index
      %c0_17 = arith.constant 0 : index
      %21 = vector.load %arg3[%c0_16, %c0_17] : memref<8x1xi32, #tpu.memory_space<vmem>>, vector<8x1xi32>
      %cst_18 = arith.constant dense<0xFF800000> : vector<8xf32>
      %22 = vector.multi_reduction <maximumf>, %20, %cst_18 [1] : vector<8x10xf32> to vector<8xf32>
      %23 = vector.shape_cast %22 : vector<8xf32> to vector<8x1xf32>
      %24 = vector.broadcast %23 : vector<8x1xf32> to vector<8x10xf32>
      %25 = arith.subf %20, %24 : vector<8x10xf32>
      %26 = math.exp %25 : vector<8x10xf32>
      %cst_19 = arith.constant dense<0.000000e+00> : vector<8xf32>
      %27 = vector.multi_reduction <add>, %26, %cst_19 [1] : vector<8x10xf32> to vector<8xf32>
      %28 = vector.shape_cast %27 : vector<8xf32> to vector<8x1xf32>
      %29 = math.log %28 : vector<8x1xf32>
      %30 = tpu.iota {dimensions = array<i32: 1>} : vector<8x10xi32>
      %31 = vector.broadcast %21 : vector<8x1xi32> to vector<8x10xi32>
      %32 = arith.cmpi eq, %30, %31 : vector<8x10xi32>
      %cst_20 = arith.constant 0.000000e+00 : f32
      %33 = vector.broadcast %cst_20 : f32 to vector<8x10xf32>
      %34 = arith.select %32, %25, %33 : vector<8x10xi1>, vector<8x10xf32>
      %cst_21 = arith.constant dense<0.000000e+00> : vector<8xf32>
      %35 = vector.multi_reduction <add>, %34, %cst_21 [1] : vector<8x10xf32> to vector<8xf32>
      %36 = vector.shape_cast %35 : vector<8xf32> to vector<8x1xf32>
      %37 = arith.subf %29, %36 : vector<8x1xf32>
      %38 = vector.shape_cast %37 : vector<8x1xf32> to vector<1x8x1xf32>
      %cst_22 = arith.constant dense<0.000000e+00> : vector<1xf32>
      %39 = vector.multi_reduction <add>, %38, %cst_22 [1, 2] : vector<1x8x1xf32> to vector<1xf32>
      %40 = vector.shape_cast %39 : vector<1xf32> to vector<1x1x1xf32>
      %41 = vector.extract %40[0, 0, 0] : f32 from vector<1x1x1xf32>
      %cst_23 = arith.constant 8.000000e+00 : f32
      %42 = arith.divf %41, %cst_23 : f32
      %c0_i32_24 = arith.constant 0 : i32
      %43 = arith.cmpi eq, %arg0, %c0_i32_24 : i32
      %cst_25 = arith.constant 0.000000e+00 : f32
      %44 = arith.select %43, %42, %cst_25 : f32
      %cst_26 = arith.constant 1.000000e+02 : f32
      %45 = arith.mulf %cst_26, %19 : f32
      %46 = arith.addf %45, %44 : f32
      %47 = vector.broadcast %46 : f32 to vector<1x128xf32>
      %c0_27 = arith.constant 0 : index
      %c0_28 = arith.constant 0 : index
      %48 = vector.load %arg7[%c0_27, %c0_28] : memref<1x128xf32, #tpu.memory_space<vmem>>, vector<1x128xf32>
      tpu.vector_store %arg7[%c0_27, %c0_28], %47 {strides = array<i32>} : memref<1x128xf32, #tpu.memory_space<vmem>>, vector<1x128xf32>,
    } else {
    }
    return
  }
  func.func @transform_0(%arg0: i32, %arg1: i32) -> (i32, i32) {
    %c0_i32 = arith.constant 0 : i32
    %c0_i32_0 = arith.constant 0 : i32
    %c0_i32_1 = arith.constant 0 : i32
    return %c0_i32, %c0_i32_0 : i32, i32
  }
  func.func @transform_1(%arg0: i32, %arg1: i32) -> (i32, i32) {
    %c0_i32 = arith.constant 0 : i32
    %c0_i32_0 = arith.constant 0 : i32
    %c0_i32_1 = arith.constant 0 : i32
    return %c0_i32, %c0_i32_0 : i32, i32
  }
  func.func @transform_2(%arg0: i32, %arg1: i32) -> (i32, i32) {
    %c1_i32 = arith.constant 1 : i32
    %0 = arith.muli %arg0, %c1_i32 : i32
    %1 = arith.addi %0, %arg1 : i32
    %c0_i32 = arith.constant 0 : i32
    %c0_i32_0 = arith.constant 0 : i32
    return %1, %c0_i32 : i32, i32
  }
  func.func @transform_3(%arg0: i32, %arg1: i32) -> (i32, i32) {
    %c1_i32 = arith.constant 1 : i32
    %0 = arith.muli %arg0, %c1_i32 : i32
    %1 = arith.addi %0, %arg1 : i32
    %c0_i32 = arith.constant 0 : i32
    %c0_i32_0 = arith.constant 0 : i32
    return %1, %c0_i32 : i32, i32
  }
  func.func @transform_4(%arg0: i32, %arg1: i32) -> (i32, i32) {
    %c1_i32 = arith.constant 1 : i32
    %0 = arith.muli %arg0, %c1_i32 : i32
    %1 = arith.addi %0, %arg1 : i32
    %c0_i32 = arith.constant 0 : i32
    %c0_i32_0 = arith.constant 0 : i32
    return %1, %c0_i32 : i32, i32
  }
  func.func @transform_5(%arg0: i32, %arg1: i32) -> (i32, i32) {
    %c0_i32 = arith.constant 0 : i32
    %c0_i32_0 = arith.constant 0 : i32
    return %c0_i32, %arg0 : i32, i32
  }
}

</mosaic_0001>

<bundles_post_ra>
// kernel: tpu_custom_call.1
= control target key start
LH: loop header
LB: loop body
LE: loop exit
PB: predicated region body
PF: predicated region fallthrough
CT: control target
= control target key end

     0   :  { %s1181_s0 = inlined_call_operand.vmem [shape: f32[8,10], index: 0, kind: input, shape index: {}]   ;;  %s1182_s1 = inlined_call_operand.vmem [shape: s32[8,1], index: 1, kind: input, shape index: {}]   ;;  %s1183_s2 = inlined_call_operand.hbm [shape: f32[32,128], index: 2, kind: input, shape index: {}]   ;;  %s1184_s3 = inlined_call_operand.hbm [shape: f32[32,128], index: 3, kind: input, shape index: {}]   ;;  %s1185_s4 = inlined_call_operand.hbm [shape: f32[32,128], index: 4, kind: input, shape index: {}]   ;;  %s1186_s5 = inlined_call_operand.hbm [shape: f32[1,256], index: 5, kind: output, shape index: {}]  }
   0x1   :  { %1199 = sst [smem:[#allocation18_spill]] %s1184_s3 }
   0x2   :  { %10 = vsyncpa [#allocation4], 0 }
   0x3   :  { %12 = vsyncpa [#allocation4 + $0x1], 0 }
   0x4   :  { %13 = vsyncpa [#allocation7], 0 }
   0x5   :  { %15 = vsyncpa [#allocation7 + $0x1], 0 }
   0x6   :  { %16 = vsyncpa [#allocation5], 0 }
   0x7   :  { %18 = vsyncpa [#allocation5 + $0x1], 0  ;;  %s885_s18 = smov 0   ;;  %s887_s19 = smov 0  }
   0x8   :  { %s889_s20 = smov 0   ;;  %s891_s21 = smov 0  }
   0x9   :  { %s893_s22 = smov 0   ;;  %s895_s23 = smov 0  }
   0xa LB: > { %1200 = sst [smem:[#allocation13_spill]] %s842_s22  ;;  %s916_s24 = sadd.s32 4294967295, %s846_s23   ;;  %s846_s23 = sphi %s895_s23, %s24_s23   ;;  %s842_s22 = sphi %s893_s22, %s1227_s22   ;;  %s838_s21 = sphi %s891_s21, %s1226_s21   ;;  %s834_s20 = sphi %s889_s20, %s1230_s20   ;;  %s830_s19 = sphi %s887_s19, %s1229_s19   ;;  %s826_s18 = sphi %s885_s18, %s1228_s18  }
   0xb   : > { %1201 = sst [smem:[#allocation14_spill]] %s846_s23  ;;  %s564_s25 = sadd.s32 4294967294, %s846_s23  }
   0xc   : > { %s36_s26 = sadd.s32 1, %s842_s22  ;;  %s87_s27 = sadd.s32 1, %s834_s20 }
   0xd   : > { %p38_p0 = scmp.ge.s32.totalorder %s36_s26, 2  ;;  %p94_p1 = scmp.ne.s32.totalorder %s834_s20, %s830_s19 }
   0xe   : > { %p95_p2 = scmp.eq.s32.totalorder %s846_s23, 0  ;;  %p100_p3 = scmp.ne.s32.totalorder %s830_s19, %s826_s18 }
   0xf   : > { %s1232_s26 = smov (%p38_p0, %s36_s26), 0  ;;  %p101_p5 = scmp.eq.s32.totalorder %s916_s24, 0 }
  0x10   : > { %1202 = sst [smem:[#allocation15_spill]] %s1232_s26  ;;  %p928_p4 = por %p95_p2, %p94_p1 }
  0x11   : > { %s84_s29 = ssub.s32 %s842_s22, %s1232_s26  ;;  %p180_p6 = scmp.eq.s32.totalorder %s916_s24, 1 }
  0x12   : > { %p85_p7 = scmp.eq.s32.totalorder %s84_s29, 0  ;;  %p936_p8 = por %p101_p5, %p100_p3 }
  0x13   : > { %p940_p9 = por %p180_p6, %p94_p1  ;;  %p186_p10 = scmp.eq.s32.totalorder %s564_s25, 1 }
  0x14   : > { %s1204_s30 = scalar_select %p936_p8, 1, 0 }
  0x15   : > { %s1205_s6 = scalar_select %p940_p9, 1, 0 }
  0x16   : > { %s945_s7 = scalar_select %p85_p7, %s834_s20, %s87_s27  }
  0x17   : > { %p947_p11 = por %p186_p10, %p100_p3  ;;  %p612_p13 = scmp.lt.s32.totalorder %s846_s23, 2 }
  0x18   : > { %1206 = sst [smem:[#allocation16_spill]] %s945_s7  ;;  %s1187_s9 = sand.u32 1, %s834_s20  }
  0x19   : > { %s1207_s8 = scalar_select %p947_p11, 1, 0 }
  0x1a   : > { %s956_s10 = sshll.u32 %s1187_s9, 4  ;;  %s959_s11 = sshll.u32 %s842_s22, 8 }
  0x1b   : > { %1208 = sst [smem:[#allocation17_spill]] %s1207_s8  ;;  %p963_p0 = pnand %p612_p13, %p928_p4 }
  0x1c   : > { %s234_s13 = sand.u32 1, %s846_s23   ;;  %s1210_s3 = sld [smem:[#allocation18_spill]] }
  0x1d   : > { %s238_s17 = scalar_lea.vmem [#allocation6], %s956_s10  ;;  %s979_s27 = scalar_lea.sflag [#allocation7], %s234_s13 }
  0x1e   : > { %s246_s25 = sshll.u32 %s238_s17, 4  ;;  %p985_p4 = pneg %p963_p0  ;;  %s976_s25 = int_to_ptr.vmem [resolvable:$true] %s246_s25 }
  0x22   : > { %s972_s16 = scalar_lea.hbm %s1210_s3, %s959_s11  ;;  %s675_s17 = scalar_lea.hbm %s1210_s3, 512 }
  0x23   : > { %s670_s28 = scalar_lea.hbm %s972_s16, 256  ;;  %p676_p7 = scmp.lt.u32.totalorder %s972_s16, %s1210_s3 }
  0x24   : > { %p671_p3 = scmp.ne.s32.totalorder %s972_s16, %s670_s28  ;;  %p677_p10 = scmp.lt.u32.totalorder %s675_s17, %s670_s28 }
  0x25   : > { %p679_p12 = scmp.lt.u32.totalorder %s670_s28, %s972_s16 }
  0x26   : > { %p673_p5 = pnand %p985_p4, %p671_p3  ;;  %p678_p13 = por %p677_p10, %p676_p7 }
  0x28   : > { %p674_p6 = pneg %p673_p5  ;;  %p680_p1 = por %p679_p12, %p678_p13 }
  0x2a   : > { %p681_p2 = pnand %p680_p1, %p674_p6 }
  0x2c   : > { %684 = shalt.err (!%p681_p2)
}
  0x2d   : > { %s685_s13 = scalar_lea.vmem %s976_s25, 256  ;;  %s848_s14 = smov [#allocation6]  }
  0x2e   : > { %p686_p3 = scmp.ne.s32.totalorder %s976_s25, %s685_s13  ;;  %s690_s15 = sshll.u32 %s848_s14, 4  ;;  %s691_s15 = int_to_ptr.vmem [resolvable:$false] %s690_s15 }
  0x2f   : > { %s692_s26 = scalar_lea.vmem %s691_s15, 512  ;;  %p693_p9 = scmp.lt.s32.totalorder %s976_s25, %s691_s15 }
  0x30   : > { %p688_p5 = pnand %p686_p3, %p985_p4  ;;  %p694_p8 = scmp.lt.s32.totalorder %s692_s26, %s685_s13 }
  0x32   : > { %p689_p11 = pneg %p688_p5  ;;  %p695_p7 = por %p694_p8, %p693_p9 }
  0x34   : > { %p696_p10 = pnand %p695_p7, %p689_p11 }
  0x36   : > { %699 = shalt.err (!%p696_p10)
}
  0x37   : > { %s1191_s9 = smov 128   ;;  %s1193_s28 = smov 8  }
  0x38   : > { %604 = dma.hbm_to_vmem [thread:$0]  (!%p963_p0), %s972_s16, 256, %s976_s25, %s979_s27, %s1191_s9, %s1191_s9, %s1193_s28  }
  0x39   : > { %p1212_p8 = scmp.lt.s32.totalorder %s846_s23, 3  ;;  %p1213_p9 = scmp.ge.s32.totalorder %s846_s23, 1 }
  0x3a   : > { %s1024_s15 = scalar_lea.hbm %s1183_s2, %s959_s11  ;;  %s216_s26 = scalar_lea.vmem [#allocation3], %s956_s10 }
  0x3b   : > { %p1016_p11 = pnand %p1213_p9, %p1212_p8  ;;  %s224_s3 = sshll.u32 %s216_s26, 4  ;;  %s1027_s3 = int_to_ptr.vmem [resolvable:$true] %s224_s3 }
  0x3c   : > { %s1033_s9 = scalar_lea.hbm %s1185_s4, %s959_s11  ;;  %s1215_s28 = sand.u32 1, %s834_s20  }
  0x3d   : > { %s1214_s17 = scalar_select %p1016_p11, 1, 0 }
  0x3e   : > { %s1037_s22 = scalar_lea.sflag [#allocation4], %s1215_s28  ;;  %s700_s7 = scalar_lea.hbm %s1024_s15, 256 }
  0x3f   : > { %p701_p12 = scmp.ne.s32.totalorder %s1024_s15, %s700_s7  ;;  %s705_s23 = scalar_lea.hbm %s1183_s2, 512 }
  0x40   : > { %p706_p6 = scmp.lt.u32.totalorder %s1024_s15, %s1183_s2  ;;  %p707_p13 = scmp.lt.u32.totalorder %s705_s23, %s700_s7 }
  0x41   : > { %p703_p1 = pnand %p701_p12, %p985_p4  ;;  %p709_p5 = scmp.lt.u32.totalorder %s700_s7, %s1024_s15 }
  0x42   : > { %p708_p3 = por %p707_p13, %p706_p6 }
  0x43   : > { %p704_p2 = pneg %p703_p1 }
  0x44   : > { %p710_p7 = por %p709_p5, %p708_p3 }
  0x46   : > { %p711_p10 = pnand %p710_p7, %p704_p2 }
  0x48   : > { %714 = shalt.err (!%p711_p10)
}
  0x49   : > { %s715_s11 = scalar_lea.vmem %s1027_s3, 256  ;;  %s851_s28 = smov [#allocation3]  }
  0x4a   : > { %p716_p8 = scmp.ne.s32.totalorder %s1027_s3, %s715_s11  ;;  %s720_s16 = sshll.u32 %s851_s28, 4  ;;  %s721_s16 = int_to_ptr.vmem [resolvable:$false] %s720_s16 }
  0x4b   : > { %s722_s8 = scalar_lea.vmem %s721_s16, 512  ;;  %p723_p1 = scmp.lt.s32.totalorder %s1027_s3, %s721_s16 }
  0x4c   : > { %p718_p9 = pnand %p716_p8, %p985_p4  ;;  %p724_p11 = scmp.lt.s32.totalorder %s722_s8, %s715_s11 }
  0x4e   : > { %p719_p12 = pneg %p718_p9  ;;  %p725_p6 = por %p724_p11, %p723_p1 }
  0x50   : > { %p726_p13 = pnand %p725_p6, %p719_p12 }
  0x52   : > { %729 = shalt.err (!%p726_p13)
}
  0x53   : > { %s1216_s23 = smov 8   ;;  %s1217_s7 = smov 128  }
  0x54   : > { %601 = dma.hbm_to_vmem [thread:$0]  (!%p963_p0), %s1024_s15, 256, %s1027_s3, %s1037_s22, %s1217_s7, %s1217_s7, %s1216_s23  }
  0x55   : > { %s260_s25 = scalar_lea.vmem [#allocation8], %s956_s10  ;;  %s730_s14 = scalar_lea.hbm %s1033_s9, 256 }
  0x56   : > { %s268_s13 = sshll.u32 %s260_s25, 4  ;;  %p731_p11 = scmp.ne.s32.totalorder %s1033_s9, %s730_s14  ;;  %s1065_s13 = int_to_ptr.vmem [resolvable:$true] %s268_s13 }
  0x57   : > { %s735_s28 = scalar_lea.hbm %s1185_s4, 512  ;;  %p736_p5 = scmp.lt.u32.totalorder %s1033_s9, %s1185_s4 }
  0x58   : > { %p733_p2 = pnand %p731_p11, %p985_p4  ;;  %p737_p7 = scmp.lt.u32.totalorder %s735_s28, %s730_s14 }
  0x59   : > { %p739_p8 = scmp.lt.u32.totalorder %s730_s14, %s1033_s9 }
  0x5a   : > { %p734_p3 = pneg %p733_p2  ;;  %p738_p10 = por %p737_p7, %p736_p5 }
  0x5c   : > { %p740_p9 = por %p739_p8, %p738_p10 }
  0x5e   : > { %p741_p12 = pnand %p740_p9, %p734_p3 }
  0x60   : > { %744 = shalt.err (!%p741_p12)
}
  0x61   : > { %s745_s3 = scalar_lea.vmem %s1065_s13, 256  ;;  %s852_s22 = smov [#allocation8]  }
  0x62   : > { %p746_p1 = scmp.ne.s32.totalorder %s1065_s13, %s745_s3  ;;  %s750_s10 = sshll.u32 %s852_s22, 4  ;;  %s751_s10 = int_to_ptr.vmem [resolvable:$false] %s750_s10 }
  0x63   : > { %s752_s15 = scalar_lea.vmem %s751_s10, 512  ;;  %p753_p11 = scmp.lt.s32.totalorder %s1065_s13, %s751_s10 }
  0x64   : > { %p748_p6 = pnand %p746_p1, %p985_p4  ;;  %p754_p2 = scmp.lt.s32.totalorder %s752_s15, %s745_s3 }
  0x66   : > { %p749_p13 = pneg %p748_p6  ;;  %p755_p5 = por %p754_p2, %p753_p11 }
  0x68   : > { %p756_p7 = pnand %p755_p5, %p749_p13 }
  0x6a   : > { %759 = shalt.err (!%p756_p7)
}
  0x6b   : > { %607 = dma.hbm_to_vmem [thread:$0]  (!%p963_p0), %s1033_s9, 256, %s1065_s13, %s979_s27, %s1217_s7, %s1217_s7, %s1216_s23  }
  0x6c   : > { %p1218_p4 = scmp.ne.s32.totalorder %s1214_s17, 0 }
  0x6d   : > { %s1095_s29 = sand.u32 (!%p1218_p4), 1, %s830_s19   ;;  %p1219_p3 = scmp.ne.s32.totalorder (!%p1218_p4), %s1204_s30, 0 }
  0x6e   : > { %280 = sbr.rel (%p1218_p4) target bundleno = 663 (0x297), region = 40  ;;  %s1098_s25 = sshll.u32 (!%p1218_p4), %s1095_s29, 4 }
  0x6f   : > { %s283_s12 = scalar_lea.sflag (!%p1218_p4), [#allocation4], %s1095_s29  ;;  %s286_s14 = scalar_lea.vmem (!%p1218_p4), [#allocation3], %s1098_s25 }
  0x75   : > { %813 = dma.done.wait (%p1219_p3), %s283_s12, 256  }
  0x76   : > { %815 = vsyncadd (%p1219_p3), %s283_s12, 4294967040  ;;  %s291_s27 = sand.u32 1, %s916_s24   ;;  %s295_s17 = scalar_lea.vmem [#allocation6], %s1098_s25 }
  0x77   : > { %s292_s9 = scalar_lea.sflag [#allocation7], %s291_s27 }
  0x78   : > { %817 = dma.done.wait (%p1219_p3), %s292_s9, 512  }
  0x79   : > { %819 = vsyncadd (%p1219_p3), %s292_s9, 4294966784  ;;  %v853_v0 = vmov 0   ;;  %vm387_vm0 = vcmask 80896   ;;  %v385_v1 = vld [vmem:[%s1181_s0] sm:$0xff]  ;;  %v399_v7 = vlaneseq  ;;  %v353_v15 = vld [vmem:[%s295_s17 + $0x8] sm:$0xff]  ;;  %s304_s24 = scalar_lea.vmem [#allocation8], %s1098_s25 }
  0x7a   : > { %665 = vset.pattern.permute.xlu0 %v853_v0  ;;  %v388_v2 = vsel %vm387_vm0, %v385_v1, -inf  ;;  %v386_v3 = vld [vmem:[%s1182_s1] sm:$0xff]  ;;  %v355_v17 = vld [vmem:[%s304_s24 + $0x8] sm:$0xff]  ;;  %vm410_vm2 = vcmask 7168   ;;  %p424_p0 = scmp.eq.s32.totalorder %s838_s21, 0  ;;  %s580_s8 = sshll.u32 %s838_s21, 4 }
  0x7b   : > { %389 = vmax.xlane.f32.xlu0 %v388_v2  ;;  %v400_v8 = vand.u32 127, %v399_v7  ;;  %v352_v14 = vld [vmem:[%s295_s17] sm:$0xff]  ;;  %v357_v19 = vsub.f32 %v353_v15, %v355_v17  ;;  %v361_v21 = vld [vmem:[%s286_s14 + $0x8] sm:$0xff]  ;;  %s339_s3 = scalar_lea.vmem [#allocation9], %s1095_s29  ;;  %s1132_s12 = scalar_lea.hbm %s1186_s5, %s580_s8 }
  0x7c   : > { %v354_v16 = vld [vmem:[%s304_s24] sm:$0xff]  ;;  %s443_s22 = sshll.u32 %s339_s3, 4  ;;  %p1220_p8 = scmp.ne.s32.totalorder %s1205_s6, 0  ;;  %s1134_s22 = int_to_ptr.vmem [resolvable:$true] %s443_s22 }
  0x7d   : > { %v356_v18 = vsub.f32 %v352_v14, %v354_v16  ;;  %v360_v20 = vld [vmem:[%s286_s14] sm:$0xff]  ;;  %v363_v23 = vmul.f32 %v361_v21, %v357_v19  ;;  %s431_s14 = scalar_lea.sflag [#allocation5], %s1095_s29  ;;  %s760_s27 = scalar_lea.vmem %s1134_s22, 16 }
  0x7e   : > { %p761_p10 = scmp.ne.s32.totalorder %s1134_s22, %s760_s27  ;;  %s854_s21 = smov [#allocation9]  }
  0x7f   : > { %v362_v22 = vmul.f32 %v360_v20, %v356_v18  ;;  %v365_v25 = vmul.f32 %v363_v23, %v357_v19  ;;  %s764_s9 = sshll.u32 %s854_s21, 4  ;;  %s765_s9 = int_to_ptr.vmem [resolvable:$false] %s764_s9 }
  0x80   : > { %p762_p9 = pnand %p761_p10, %p1220_p8  ;;  %s766_s17 = scalar_lea.vmem %s765_s9, 32 }
  0x81   : > { %v364_v24 = vmul.f32 %v362_v22, %v356_v18  ;;  %p767_p1 = scmp.lt.s32.totalorder %s1134_s22, %s765_s9  ;;  %p768_p6 = scmp.lt.s32.totalorder %s766_s17, %s760_s27 }
  0x82   : > { %p763_p12 = pneg %p762_p9 }
  0x83   : > { %v375_v26 = vadd.f32 %v365_v25, %v364_v24  ;;  %p769_p13 = por %p768_p6, %p767_p1 }
  0x85   : > { %p770_p11 = pnand %p769_p13, %p763_p12 }
  0x91   : > { %402 = vperm.xlu0 %665, %v386_v3  }
 0x108   : > { %v390_v4 = vpop.xlane.xlu0 %389 }
 0x109   : > { %v391_v5 = vsub.f32 %v385_v1, %v390_v4 }
 0x10b   : > { %v392_v6 = vmul.f32 1.442695, %v391_v5 }
 0x10d   : > { %666 = vpow2.f32 %v392_v6 }
 0x110   : > { %v403_v9 = vpop.permute.xlu0 %402 }
 0x111   : > { %vm404_vm1 = vcmp.eq.s32.totalorder %v400_v8, %v403_v9 }
 0x112   : > { %v405_v12 = vsel %vm404_vm1, %v391_v5, 0.0 }
 0x113   : > { %v406_v13 = vsel %vm387_vm0, %v405_v12, 0.0 }
 0x117   : > { %v667_v10 = vpop.eup %666 }
 0x118   : > { %v394_v11 = vsel %vm387_vm0, %v667_v10, 0.0 }
 0x119   : > { %395 = vadd.xlane.f32.xlu1 %v394_v11 }
 0x11d   : > { %407 = vadd.xlane.f32.xlu1 %v406_v13 }
 0x121   : > { %376 = vadd.xlane.f32.xlu1 %v375_v26 }
 0x1a6   : > { %v396_v27 = vpop.xlane.xlu1 %395 }
 0x1a7   : > { %668 = vlog2.f32 %v396_v27 }
 0x1aa   : > { %v408_v30 = vpop.xlane.xlu1 %407 }
 0x1ae   : > { %v377_v33 = vpop.xlane.xlu1 %376 }
 0x1af   : > { %v378_v34 = vrot.slane %v377_v33, 4 }
 0x1b1   : > { %v669_v28 = vpop.eup %668  ;;  %v379_v35 = vadd.f32 %v378_v34, %v377_v33 }
 0x1b2   : > { %v398_v29 = vmul.f32 0.6931472, %v669_v28 }
 0x1b3   : > { %v380_v36 = vrot.slane %v379_v35, 2 }
 0x1b4   : > { %v409_v31 = vsub.f32 %v398_v29, %v408_v30 }
 0x1b5   : > { %v381_v37 = vadd.f32 %v380_v36, %v379_v35 }
 0x1b6   : > { %v411_v32 = vsel %vm410_vm2, %v409_v31, 0.0 }
 0x1b7   : > { %412 = vadd.xlane.f32.xlu1 %v411_v32  ;;  %v382_v38 = vrot.slane %v381_v37, 1 }
 0x1b9   : > { %v383_v39 = vadd.f32 %v382_v38, %v381_v37 }
 0x1bb   : > { %586 = vpush %v383_v39 }
 0x1ec   : > { %s587_s30 = spop %586 }
 0x1ed   : > { %s426_s11 = smul.f32 100.0, %s587_s30 }
 0x244   : > { %v413_v40 = vpop.xlane.xlu1 %412 }
 0x245   : > { %v414_v41 = vrot.slane %v413_v40, 4 }
 0x247   : > { %v415_v42 = vadd.f32 %v414_v41, %v413_v40 }
 0x249   : > { %v416_v43 = vrot.slane %v415_v42, 2 }
 0x24b   : > { %v417_v44 = vadd.f32 %v416_v43, %v415_v42 }
 0x24d   : > { %v418_v45 = vrot.slane %v417_v44, 1 }
 0x24f   : > { %v419_v46 = vadd.f32 %v418_v45, %v417_v44 }
 0x251   : > { %588 = vpush %v419_v46 }
 0x282   : > { %s589_s28 = spop %588 }
 0x283   : > { %s423_s16 = smul.f32 0.125, %s589_s28 }
 0x285   : > { %s1234_s16 = smov (!%p424_p0, %s423_s16), 0.0 }
 0x286   : > { %s427_s10 = sadd.f32 %s426_s11, %s1234_s16 }
 0x288   : > { %v428_v47 = vstv %s427_s10 }
 0x289   : > { %429 = vst [vmem:[%s339_s3] sm:$0x1] %v428_v47 }
 0x28a   : > { %773 = shalt.err (!%p770_p11)
}
 0x28b   : > { %s774_s29 = scalar_lea.hbm %s1132_s12, 16  ;;  %s778_s13 = scalar_lea.hbm %s1186_s5, 32 }
 0x28c   : > { %p775_p2 = scmp.ne.s32.totalorder %s1132_s12, %s774_s29  ;;  %p779_p4 = scmp.lt.u32.totalorder %s1132_s12, %s1186_s5 }
 0x28d   : > { %p780_p3 = scmp.lt.u32.totalorder %s778_s13, %s774_s29  ;;  %p782_p10 = scmp.lt.u32.totalorder %s774_s29, %s1132_s12 }
 0x28e   : > { %p776_p5 = pnand %p775_p2, %p1220_p8 }
 0x28f   : > { %p781_p0 = por %p780_p3, %p779_p4 }
 0x290   : > { %p777_p7 = pneg %p776_p5 }
 0x291   : > { %p783_p9 = por %p782_p10, %p781_p0 }
 0x293   : > { %p784_p12 = pnand %p783_p9, %p777_p7 }
 0x295   : > { %787 = shalt.err (!%p784_p12)
}
 0x296   : > { %596 = dma.vmem_to_hbm [thread:$0]  (%p1220_p8), %s1134_s22, 16, %s1132_s12, %s431_s14  }
 0x297 PF: > { %s1221_s30 = sld [smem:[#allocation17_spill]]  ;;  %s1222_s11 = sld [smem:[#allocation14_spill]] }
 0x298   : > { %s455_s28 = sand.u32 1, %s826_s18  }
 0x299   : > { %s456_s16 = scalar_lea.sflag [#allocation5], %s455_s28 }
 0x29d   : > { %p1223_p1 = scmp.ne.s32.totalorder %s1221_s30, 0  ;;  %p1224_p6 = scmp.ge.s32.totalorder %s1222_s11, 2 }
 0x29f   : > { %p609_p13 = pnand %p1224_p6, %p1223_p1 }
 0x2a1   : > { %821 = dma.done.wait (!%p609_p13), %s456_s16, 16  }
 0x2a2   : > { %823 = vsyncadd (!%p609_p13), %s456_s16, 4294967280  ;;  %s24_s23 = sadd.s32 1, %s1222_s11   ;;  %s1225_s6 = sld [smem:[#allocation16_spill]] }
 0x2a3   : > { %p21_p11 = scmp.ge.s32.totalorder %s24_s23, 4   ;;  %s1226_s21 = sld [smem:[#allocation13_spill]] }
 0x2a4   : > { %s1227_s22 = sld [smem:[#allocation15_spill]]  ;;  %s1228_s18 = smov %s830_s19 }
 0x2a5   : > { %s1229_s19 = smov %s834_s20  ;;  %23 = sbr.rel (!%p21_p11) target bundleno = 10 (0xa), region = 117 }
 0x2a8   : > { %s1230_s20 = smov %s1225_s6 }
 0x2ac   :  { %460 = vsyncpa [#allocation4], 1 }
 0x2ad   :  { %462 = vsyncpa [#allocation4 + $0x1], 1 }
 0x2ae   :  { %463 = vsyncpa [#allocation7], 1 }
 0x2af   :  { %465 = vsyncpa [#allocation7 + $0x1], 1 }
 0x2b0   :  { %466 = vsyncpa [#allocation5], 1 }
 0x2b1   :  { %468 = vsyncpa [#allocation5 + $0x1], 1 }

</bundles_post_ra>
